<compile_context>
chip_gen: v7x
topology: tpu7x:2x2x1
jax: 0.10.0
libtpu: 0.0.40
codegen_flags: <defaults>
</compile_context>

<pallas_src>
import math
from functools import partial

import jax
import jax.numpy as jnp
from jax.experimental import pallas as pl
from jax.experimental.pallas import tpu as pltpu

LOG_2PI = math.log(2.0 * math.pi)


def _round8(n: int) -> int:
    return ((n + 7) // 8) * 8


def _objective_kernel(params_ref, const_ref, out_ref, *, P, T, a_off, t_off, use_mxu):
    """Column ("candidates on lanes") layout.

    params_ref : (P, BB)  candidate parameter vectors, one per lane
    const_ref  : (R, W)   packed constant slab:
                   rows [0:P]            -> [flat | 1/(2 sp^2) | -log sp - c | 0...]
                   rows [a_off:a_off+T]  -> A^T (T, P) zero-padded to W lanes
                   rows [t_off:t_off+T]  -> [b | exp | 1/(2 u^2) | -log u - c | 0...]
    out_ref    : (1, BB)  lane-dense -(prior + objective) per candidate
    """
    p = params_ref[...]                              # (P, BB)

    # ---- prior: Normal(flat, prior_width*flat).log_prob(params), summed over P ----
    flat = const_ref[0:P, 0:1]                       # (P, 1) broadcast over BB lanes
    inv2vp = const_ref[0:P, 1:2]
    logcp = const_ref[0:P, 2:3]
    dp = p - flat
    prior = jnp.sum(-(dp * dp) * inv2vp + logcp, axis=0, keepdims=True)        # (1, BB)

    # ---- surrogate mean: pred = A^T @ params + b  ->  (T, BB) ----
    at = const_ref[a_off:a_off + T, 0:P]             # (T, P)
    b_col = const_ref[t_off:t_off + T, 0:1]          # (T, 1)
    e_col = const_ref[t_off:t_off + T, 1:2]
    inv2vt = const_ref[t_off:t_off + T, 2:3]
    logct = const_ref[t_off:t_off + T, 3:4]

    if use_mxu:
        pred = jnp.dot(at, p, preferred_element_type=jnp.float32) + b_col
    else:
        # K = P is tiny: unrolled VPU multiply-accumulate instead of a nearly-empty
        # MXU pass (largest win on v5e/v6e where the MRF pop is sequential).
        acc = at[:, 0:1] * p[0:1, :]
        for k in range(1, P):
            acc = acc + at[:, k:k + 1] * p[k:k + 1, :]
        pred = acc + b_col

    # ---- objective: Normal(exp, unc).log_prob(pred), summed over T ----
    dt = pred - e_col
    objective = jnp.sum(-(dt * dt) * inv2vt + logct, axis=0, keepdims=True)    # (1, BB)

    out_ref[...] = -(prior + objective)


def make_constrained_gaussian_objective(flat_parameters, prior_width,
                                        surrogate_A, surrogate_b,
                                        experimental_values, uncertainty_values,
                                        *, max_lanes_per_block=2048):
    """Precompute parameter-independent constants once; return (single_eval, batch_eval)."""
    P = int(flat_parameters.shape[0])
    T = int(experimental_values.shape[0])
    W = max(P, 4)                      # slab lane width fits 3 prior cols, 4 target cols, A^T

    flat = jnp.asarray(flat_parameters, jnp.float32)
    scale_p = jnp.asarray(prior_width, jnp.float32) * flat
    unc = jnp.asarray(uncertainty_values, jnp.float32)
    # torch.distributions.Normal raises on scale <= 0; the precomputed -log / 1/(2 s^2)
    # would silently become nan/inf instead, so mirror the check once here.
    assert bool(jnp.all(scale_p > 0)), "prior_width * flat_parameters must be > 0"
    assert bool(jnp.all(unc > 0)), "uncertainty_values must be > 0"

    p_block = jnp.stack([flat,
                         1.0 / (2.0 * scale_p * scale_p),
                         -jnp.log(scale_p) - 0.5 * LOG_2PI], axis=1)           # (P, 3)
    at = jnp.asarray(surrogate_A, jnp.float32).T                               # (T, P)
    t_block = jnp.stack([jnp.asarray(surrogate_b, jnp.float32),
                         jnp.asarray(experimental_values, jnp.float32),
                         1.0 / (2.0 * unc * unc),
                         -jnp.log(unc) - 0.5 * LOG_2PI], axis=1)               # (T, 4)

    P8, T8 = _round8(P), _round8(T)                  # 8-row aligned sections
    a_off, t_off = P8, P8 + T8
    R = P8 + 2 * T8
    const = jnp.concatenate([
        jnp.pad(p_block, ((0, P8 - P), (0, W - 3))),
        jnp.pad(at, ((0, T8 - T), (0, W - P))),
        jnp.pad(t_block, ((0, T8 - T), (0, W - 4))),
    ], axis=0)                                                                  # (R, W)

    def _call(params_t):                             # params_t: (P, B) f32
        B = params_t.shape[1]
        if B <= max_lanes_per_block or B % max_lanes_per_block != 0:
            bb, nblk = B, 1
        else:
            bb, nblk = max_lanes_per_block, B // max_lanes_per_block
        kernel = partial(_objective_kernel, P=P, T=T, a_off=a_off, t_off=t_off,
                         use_mxu=bb >= 128)
        if nblk == 1:
            # One block of work: no grid machinery, whole (tiny) operands resident in VMEM.
            return pl.pallas_call(
                kernel,
                out_shape=jax.ShapeDtypeStruct((1, B), jnp.float32),
                in_specs=[pl.BlockSpec(memory_space=pltpu.MemorySpace.VMEM),
                          pl.BlockSpec(memory_space=pltpu.MemorySpace.VMEM)],
                out_specs=pl.BlockSpec(memory_space=pltpu.MemorySpace.VMEM),
            )(params_t, const)
        # Very large batches only: tile the lane (candidate) axis.  "parallel" lets
        # v7x shard blocks over its two TensorCores (measured no-op on v5e/v6e).
        return pl.pallas_call(
            kernel,
            out_shape=jax.ShapeDtypeStruct((1, B), jnp.float32),
            grid=(nblk,),
            in_specs=[pl.BlockSpec((P, bb), lambda i: (0, i)),
                      pl.BlockSpec((R, W), lambda i: (0, 0))],
            out_specs=pl.BlockSpec((1, bb), lambda i: (0, i)),
            compiler_params=pltpu.CompilerParams(
                dimension_semantics=("parallel",)),
        )(params_t, const)

    @jax.jit
    def objective(parameters):
        """Scalar -(prior + objective) for one flat parameter vector of shape (P,)."""
        p_col = jnp.asarray(parameters, jnp.float32).reshape(P, 1)
        return _call(p_col)[0, 0]

    @jax.jit
    def objective_batch(params_batch):
        """(B,) of -(prior + objective) for a (B, P) batch of candidate vectors."""
        pb = jnp.asarray(params_batch, jnp.float32)
        # Layout plumbing only: candidates on the lane axis -> lane-dense (1, B) output.
        return _call(pb.T)[0, :]

    return objective, objective_batch


def _reference(parameters, flat_parameters, prior_width, A, b, exp_vals, unc_vals):
    pred = parameters @ A + b

    def logprob(x, loc, scale):
        return -((x - loc) ** 2) / (2.0 * scale ** 2) - jnp.log(scale) - 0.5 * LOG_2PI

    prior = jnp.sum(logprob(parameters, flat_parameters, prior_width * flat_parameters))
    objective = jnp.sum(logprob(pred, exp_vals, unc_vals))
    return -(prior + objective)


if __name__ == "__main__":
    key = jax.random.PRNGKey(0)
    k1, k2, k3, k4, k5, k6, k7, k8 = jax.random.split(key, 8)

    # 4 LJ parameter keys -> (epsilon, rmin_half) each => P = 8 flat parameters
    P = 8
    # 6 experimental target properties => T = 6
    T = 6
    prior_width = 0.1

    flat_parameters = jax.random.uniform(k1, (P,), jnp.float32, 0.5, 2.0)   # strictly positive
    parameters = flat_parameters * (1.0 + 0.05 * jax.random.normal(k2, (P,), jnp.float32))

    experimental_values = jax.random.uniform(k3, (T,), jnp.float32, 0.1, 1.0)
    uncertainty_values = jax.random.uniform(k4, (T,), jnp.float32, 0.01, 0.1)

    # deterministic synthetic linear surrogate (stand-in for the GP posterior mean)
    surrogate_A = 0.1 * jax.random.normal(k5, (P, T), jnp.float32)
    surrogate_b = jax.random.uniform(k6, (T,), jnp.float32, 0.1, 1.0)

    objective_fn, objective_batch_fn = make_constrained_gaussian_objective(
        flat_parameters, prior_width, surrogate_A, surrogate_b,
        experimental_values, uncertainty_values)

    # ---- single candidate (the module's forward(parameters)); batch-of-1, VPU path ----
    result = jax.block_until_ready(objective_fn(parameters))
    ref = _reference(parameters, flat_parameters, prior_width,
                     surrogate_A, surrogate_b, experimental_values, uncertainty_values)
    assert bool(jnp.isfinite(result)), "single-point evaluation produced non-finite output"
    assert bool(jnp.allclose(result, ref, rtol=2e-4, atol=1e-3)), (result, ref)

    ref_vmapped = jax.vmap(
        lambda p: _reference(p, flat_parameters, prior_width, surrogate_A, surrogate_b,
                             experimental_values, uncertainty_values))

    # ---- small batch: single grid-less block, unrolled VPU contraction (no MXU) ----
    B_small = 16
    batch_small = flat_parameters[None, :] * (
        1.0 + 0.05 * jax.random.normal(k7, (B_small, P), jnp.float32))
    out_small = jax.block_until_ready(objective_batch_fn(batch_small))
    ref_small = ref_vmapped(batch_small)
    assert out_small.shape == (B_small,)
    assert bool(jnp.all(jnp.isfinite(out_small))), "batched evaluation produced non-finite output"
    assert bool(jnp.allclose(out_small, ref_small, rtol=2e-4, atol=1e-3)), (out_small, ref_small)

    # ---- larger batch: still one grid-less block, MXU contraction (BB >= 128) ----
    B_big = 256
    batch_big = flat_parameters[None, :] * (
        1.0 + 0.05 * jax.random.normal(k8, (B_big, P), jnp.float32))
    out_big = jax.block_until_ready(objective_batch_fn(batch_big))
    ref_big = ref_vmapped(batch_big)
    assert out_big.shape == (B_big,)
    assert bool(jnp.all(jnp.isfinite(out_big))), "batched evaluation produced non-finite output"
    # slightly looser: MXU f32 passes vs XLA reference matmul rounding
    assert bool(jnp.allclose(out_big, ref_big, rtol=1e-3, atol=1e-2)), (out_big, ref_big)

    print("KERNEL_OK")
</pallas_src>

<mosaic_0001>
module attributes {stable_mosaic.version = 11 : i64} {
  func.func @_objective_kernel(%arg0: memref<8x1xf32, #tpu.memory_space<vmem>>, %arg1: memref<24x8xf32, #tpu.memory_space<vmem>>, %arg2: memref<1x1xf32, #tpu.memory_space<vmem>>) attributes {dimension_semantics = [], scalar_prefetch = 0 : i64, scratch_operands = 0 : i64, tpu.core_type = #tpu.core_type<tc>} {
    %c0 = arith.constant 0 : index
    %c0_0 = arith.constant 0 : index
    %0 = vector.load %arg0[%c0, %c0_0] : memref<8x1xf32, #tpu.memory_space<vmem>>, vector<8x1xf32>
    %c0_1 = arith.constant 0 : index
    %c0_2 = arith.constant 0 : index
    %1 = vector.load %arg1[%c0_1, %c0_2] : memref<24x8xf32, #tpu.memory_space<vmem>>, vector<8x1xf32>
    %c0_3 = arith.constant 0 : index
    %c1 = arith.constant 1 : index
    %2 = vector.load %arg1[%c0_3, %c1] : memref<24x8xf32, #tpu.memory_space<vmem>>, vector<8x1xf32>
    %c0_4 = arith.constant 0 : index
    %c2 = arith.constant 2 : index
    %3 = vector.load %arg1[%c0_4, %c2] : memref<24x8xf32, #tpu.memory_space<vmem>>, vector<8x1xf32>
    %4 = arith.subf %0, %1 : vector<8x1xf32>
    %5 = arith.mulf %4, %4 : vector<8x1xf32>
    %cst = arith.constant 0.000000e+00 : f32
    %6 = vector.broadcast %cst : f32 to vector<8x1xf32>
    %7 = arith.subf %6, %5 : vector<8x1xf32>
    %8 = arith.mulf %7, %2 : vector<8x1xf32>
    %9 = arith.addf %8, %3 : vector<8x1xf32>
    %cst_5 = arith.constant dense<0.000000e+00> : vector<1xf32>
    %10 = vector.multi_reduction <add>, %9, %cst_5 [0] : vector<8x1xf32> to vector<1xf32>
    %11 = vector.shape_cast %10 : vector<1xf32> to vector<1x1xf32>
    %c8 = arith.constant 8 : index
    %c0_6 = arith.constant 0 : index
    %12 = vector.load %arg1[%c8, %c0_6] : memref<24x8xf32, #tpu.memory_space<vmem>>, vector<6x8xf32>
    %c16 = arith.constant 16 : index
    %c0_7 = arith.constant 0 : index
    %13 = vector.load %arg1[%c16, %c0_7] : memref<24x8xf32, #tpu.memory_space<vmem>>, vector<6x1xf32>
    %c16_8 = arith.constant 16 : index
    %c1_9 = arith.constant 1 : index
    %14 = vector.load %arg1[%c16_8, %c1_9] : memref<24x8xf32, #tpu.memory_space<vmem>>, vector<6x1xf32>
    %c16_10 = arith.constant 16 : index
    %c2_11 = arith.constant 2 : index
    %15 = vector.load %arg1[%c16_10, %c2_11] : memref<24x8xf32, #tpu.memory_space<vmem>>, vector<6x1xf32>
    %c16_12 = arith.constant 16 : index
    %c3 = arith.constant 3 : index
    %16 = vector.load %arg1[%c16_12, %c3] : memref<24x8xf32, #tpu.memory_space<vmem>>, vector<6x1xf32>
    %17 = vector.extract_strided_slice %12 {offsets = [0, 0], sizes = [6, 1], strides = [1, 1]} : vector<6x8xf32> to vector<6x1xf32>
    %18 = vector.extract_strided_slice %0 {offsets = [0, 0], sizes = [1, 1], strides = [1, 1]} : vector<8x1xf32> to vector<1x1xf32>
    %19 = vector.broadcast %18 : vector<1x1xf32> to vector<6x1xf32>
    %20 = arith.mulf %17, %19 : vector<6x1xf32>
    %21 = vector.extract_strided_slice %12 {offsets = [0, 1], sizes = [6, 1], strides = [1, 1]} : vector<6x8xf32> to vector<6x1xf32>
    %22 = vector.extract_strided_slice %0 {offsets = [1, 0], sizes = [1, 1], strides = [1, 1]} : vector<8x1xf32> to vector<1x1xf32>
    %23 = vector.broadcast %22 : vector<1x1xf32> to vector<6x1xf32>
    %24 = arith.mulf %21, %23 : vector<6x1xf32>
    %25 = arith.addf %20, %24 : vector<6x1xf32>
    %26 = vector.extract_strided_slice %12 {offsets = [0, 2], sizes = [6, 1], strides = [1, 1]} : vector<6x8xf32> to vector<6x1xf32>
    %27 = vector.extract_strided_slice %0 {offsets = [2, 0], sizes = [1, 1], strides = [1, 1]} : vector<8x1xf32> to vector<1x1xf32>
    %28 = vector.broadcast %27 : vector<1x1xf32> to vector<6x1xf32>
    %29 = arith.mulf %26, %28 : vector<6x1xf32>
    %30 = arith.addf %25, %29 : vector<6x1xf32>
    %31 = vector.extract_strided_slice %12 {offsets = [0, 3], sizes = [6, 1], strides = [1, 1]} : vector<6x8xf32> to vector<6x1xf32>
    %32 = vector.extract_strided_slice %0 {offsets = [3, 0], sizes = [1, 1], strides = [1, 1]} : vector<8x1xf32> to vector<1x1xf32>
    %33 = vector.broadcast %32 : vector<1x1xf32> to vector<6x1xf32>
    %34 = arith.mulf %31, %33 : vector<6x1xf32>
    %35 = arith.addf %30, %34 : vector<6x1xf32>
    %36 = vector.extract_strided_slice %12 {offsets = [0, 4], sizes = [6, 1], strides = [1, 1]} : vector<6x8xf32> to vector<6x1xf32>
    %37 = vector.extract_strided_slice %0 {offsets = [4, 0], sizes = [1, 1], strides = [1, 1]} : vector<8x1xf32> to vector<1x1xf32>
    %38 = vector.broadcast %37 : vector<1x1xf32> to vector<6x1xf32>
    %39 = arith.mulf %36, %38 : vector<6x1xf32>
    %40 = arith.addf %35, %39 : vector<6x1xf32>
    %41 = vector.extract_strided_slice %12 {offsets = [0, 5], sizes = [6, 1], strides = [1, 1]} : vector<6x8xf32> to vector<6x1xf32>
    %42 = vector.extract_strided_slice %0 {offsets = [5, 0], sizes = [1, 1], strides = [1, 1]} : vector<8x1xf32> to vector<1x1xf32>
    %43 = vector.broadcast %42 : vector<1x1xf32> to vector<6x1xf32>
    %44 = arith.mulf %41, %43 : vector<6x1xf32>
    %45 = arith.addf %40, %44 : vector<6x1xf32>
    %46 = vector.extract_strided_slice %12 {offsets = [0, 6], sizes = [6, 1], strides = [1, 1]} : vector<6x8xf32> to vector<6x1xf32>
    %47 = vector.extract_strided_slice %0 {offsets = [6, 0], sizes = [1, 1], strides = [1, 1]} : vector<8x1xf32> to vector<1x1xf32>
    %48 = vector.broadcast %47 : vector<1x1xf32> to vector<6x1xf32>
    %49 = arith.mulf %46, %48 : vector<6x1xf32>
    %50 = arith.addf %45, %49 : vector<6x1xf32>
    %51 = vector.extract_strided_slice %12 {offsets = [0, 7], sizes = [6, 1], strides = [1, 1]} : vector<6x8xf32> to vector<6x1xf32>
    %52 = vector.extract_strided_slice %0 {offsets = [7, 0], sizes = [1, 1], strides = [1, 1]} : vector<8x1xf32> to vector<1x1xf32>
    %53 = vector.broadcast %52 : vector<1x1xf32> to vector<6x1xf32>
    %54 = arith.mulf %51, %53 : vector<6x1xf32>
    %55 = arith.addf %50, %54 : vector<6x1xf32>
    %56 = arith.addf %55, %13 : vector<6x1xf32>
    %57 = arith.subf %56, %14 : vector<6x1xf32>
    %58 = arith.mulf %57, %57 : vector<6x1xf32>
    %cst_13 = arith.constant 0.000000e+00 : f32
    %59 = vector.broadcast %cst_13 : f32 to vector<6x1xf32>
    %60 = arith.subf %59, %58 : vector<6x1xf32>
    %61 = arith.mulf %60, %15 : vector<6x1xf32>
    %62 = arith.addf %61, %16 : vector<6x1xf32>
    %cst_14 = arith.constant dense<0.000000e+00> : vector<1xf32>
    %63 = vector.multi_reduction <add>, %62, %cst_14 [0] : vector<6x1xf32> to vector<1xf32>
    %64 = vector.shape_cast %63 : vector<1xf32> to vector<1x1xf32>
    %65 = arith.addf %11, %64 : vector<1x1xf32>
    %cst_15 = arith.constant 0.000000e+00 : f32
    %66 = vector.broadcast %cst_15 : f32 to vector<1x1xf32>
    %67 = arith.subf %66, %65 : vector<1x1xf32>
    %c0_16 = arith.constant 0 : index
    %c0_17 = arith.constant 0 : index
    %68 = vector.load %arg2[%c0_16, %c0_17] : memref<1x1xf32, #tpu.memory_space<vmem>>, vector<1x1xf32>
    tpu.vector_store %arg2[%c0_16, %c0_17], %67 {strides = array<i32>} : memref<1x1xf32, #tpu.memory_space<vmem>>, vector<1x1xf32>,
    return
  }
}

</mosaic_0001>

<bundles_post_ra>
// kernel: objective.1
= control target key start
LH: loop header
LB: loop body
LE: loop exit
PB: predicated region body
PF: predicated region fallthrough
CT: control target
= control target key end

     0   :  { %7 = vsyncpa [#allocation3], 0  ;;  %s333_s0 = inlined_call_operand.vmem [shape: f32[8,1], index: 0, kind: input, shape index: {}]   ;;  %s334_s1 = inlined_call_operand.hbm [shape: f32[24,8], index: 1, kind: input, shape index: {}]   ;;  %s335_s2 = inlined_call_operand.hbm [shape: f32[1,1], index: 2, kind: output, shape index: {}]  }
   0x1   :  { %8 = vsyncpa [#allocation4], 0  ;;  %s262_s9 = smov [#allocation2]   ;;  %s214_s13 = scalar_lea.hbm %s334_s1, 384 }
   0x2   :  { %s16_s10 = sshll.u32 %s262_s9, 4  ;;  %p215_p0 = scmp.ne.s32.totalorder %s334_s1, %s214_s13  ;;  %s17_s10 = int_to_ptr.vmem [resolvable:$true] %s16_s10 }
   0x3   :  { %p218_p1 = scmp.lt.u32.totalorder %s214_s13, %s334_s1 }
   0x5   :  { %p220_p2 = pnand %p218_p1, %p215_p0 }
   0x7   :  { %223 = shalt.err (!%p220_p2)
}
   0x8   :  { %s224_s18 = scalar_lea.vmem %s17_s10, 384  ;;  %p229_p4 = scmp.lt.s32.totalorder %s17_s10, %s17_s10 }
   0x9   :  { %p225_p3 = scmp.ne.s32.totalorder %s17_s10, %s224_s18  ;;  %p230_p5 = scmp.lt.s32.totalorder %s224_s18, %s224_s18 }
   0xb   :  { %p231_p6 = por %p230_p5, %p229_p4 }
   0xd   :  { %p232_p7 = pnand %p231_p6, %p225_p3 }
   0xf   :  { %235 = shalt.err (!%p232_p7)
}
  0x10   :  { %s263_s19 = smov 128   ;;  %s264_s20 = smov 8  }
  0x11   :  { %22 = dma.hbm_to_vmem [thread:$0]  %s334_s1, 384, %s17_s10, [#allocation3], %s263_s19, %s263_s19, %s264_s20  }
  0x12   :  { %258 = dma.done.wait [#allocation3], 384  }
  0x13   :  { %259 = vsyncadd [#allocation3], 4294966912  ;;  %v50_v0 = vlaneseq  ;;  %v310_v6 = vld [vmem:[%s333_s0] sm:$0xff]  ;;  %s265_s25 = smov 1   ;;  %s266_s1 = smov 3   ;;  %vm40_vm0 = vcmask 7168  }
  0x14   :  { %s267_s26 = smov 2   ;;  %s268_s27 = smov 4   ;;  %v48_v19 = vld [vmem:[#allocation2 + $0x8] sm:$0x3f]  ;;  %v27_v35 = vld [vmem:[#allocation2] sm:$0xff]  ;;  %vm169_vm1 = vcmask 5120  }
  0x15   :  { %v51_v1 = vshrl.u32 %v50_v0, 7  ;;  %s269_s0 = smov 5   ;;  %s270_s28 = smov 6   ;;  %v49_v36 = vld [vmem:[#allocation2 + $0x10] sm:$0x3f]  ;;  %v28_v42 = vsub.f32 %v310_v6, %v27_v35  ;;  %vm179_vm2 = vcmask 0  }
  0x16   :  { %s271_s29 = smov 7   ;;  %s272_s30 = smov 127  }
  0x17   :  { %v57_v2 = vsub.s32 1, %v51_v1  ;;  %v85_v3 = vsub.s32 3, %v51_v1  ;;  %v71_v4 = vsub.s32 2, %v51_v1  ;;  %v99_v5 = vsub.s32 4, %v51_v1  ;;  %s273_s3 = smov 125   ;;  %s274_s4 = smov 126  }
  0x18   :  { %v113_v11 = vsub.s32 5, %v51_v1  ;;  %v127_v12 = vsub.s32 6, %v51_v1  ;;  %v141_v15 = vsub.s32 7, %v51_v1  ;;  %v52_v17 = vsub.s32 0, %v51_v1  ;;  %s275_s5 = smov 124   ;;  %s276_s6 = smov 123  }
  0x19   :  { %v58_v7 = vrot.slane %v310_v6, %v57_v2  ;;  %v86_v8 = vrot.slane %v310_v6, %v85_v3  ;;  %v72_v9 = vrot.slane %v310_v6, %v71_v4  ;;  %v100_v10 = vrot.slane %v310_v6, %v99_v5  ;;  %s277_s7 = smov 122   ;;  %s278_s8 = smov 121  }
  0x1a   :  { %v114_v13 = vrot.slane %v310_v6, %v113_v11  ;;  %v128_v14 = vrot.slane %v310_v6, %v127_v12  ;;  %v142_v16 = vrot.slane %v310_v6, %v141_v15  ;;  %v53_v18 = vrot.slane %v310_v6, %v52_v17  ;;  %s279_s9 = smov [#allocation5]  }
  0x1b   :  { %60 = vrot.lane.b32.xlu0 %v58_v7, %s265_s25  ;;  %88 = vrot.lane.b32.xlu1 %v86_v8, %s266_s1  ;;  %v29_v47 = vmul.f32 %v28_v42, %v28_v42  ;;  %s187_s10 = sshll.u32 %s279_s9, 4  ;;  %s188_s10 = int_to_ptr.vmem [resolvable:$true] %s187_s10 }
  0x1c   :  { %v54_v20 = vmul.f32 %v53_v18, %v48_v19  ;;  %s236_s11 = scalar_lea.vmem %s188_s10, 16  ;;  %s240_s12 = scalar_lea.vmem %s188_s10, 32 }
  0x1d   :  { %v30_v52 = vsub.f32 0.0, %v29_v47  ;;  %p237_p8 = scmp.ne.s32.totalorder %s188_s10, %s236_s11  ;;  %p241_p9 = scmp.lt.s32.totalorder %s188_s10, %s188_s10 }
  0x1e   :  { %p242_p10 = scmp.lt.s32.totalorder %s240_s12, %s236_s11 }
  0x1f   :  { %74 = vrot.lane.b32.xlu0 %v72_v9, %s267_s26  ;;  %102 = vrot.lane.b32.xlu1 %v100_v10, %s268_s27 }
  0x20   :  { %p243_p11 = por %p242_p10, %p241_p9 }
  0x22   :  { %p244_p12 = pnand %p243_p11, %p237_p8 }
  0x23   :  { %116 = vrot.lane.b32.xlu0 %v114_v13, %s269_s0  ;;  %130 = vrot.lane.b32.xlu1 %v128_v14, %s270_s28 }
  0x27   :  { %144 = vrot.lane.b32.xlu0 %v142_v16, %s271_s29 }
  0x8d   :  { %v61_v21 = vpop.permute.xlu0 %60  ;;  %v89_v22 = vpop.permute.xlu1 %88 }
  0x8e   :  { %v63_v23 = vmul.f32 %v61_v21, %v48_v19  ;;  %v91_v24 = vmul.f32 %v89_v22, %v48_v19 }
  0x90   :  { %65 = vrot.lane.b32.xlu1 %v63_v23, %s272_s30 }
  0x91   :  { %v75_v25 = vpop.permute.xlu0 %74  ;;  %v103_v26 = vpop.permute.xlu1 %102 }
  0x92   :  { %v77_v27 = vmul.f32 %v75_v25, %v48_v19  ;;  %v105_v28 = vmul.f32 %v103_v26, %v48_v19 }
  0x94   :  { %93 = vrot.lane.b32.xlu1 %v91_v24, %s273_s3  ;;  %79 = vrot.lane.b32.xlu0 %v77_v27, %s274_s4 }
  0x95   :  { %v117_v29 = vpop.permute.xlu0 %116  ;;  %v131_v30 = vpop.permute.xlu1 %130 }
  0x96   :  { %v119_v31 = vmul.f32 %v117_v29, %v48_v19  ;;  %v133_v32 = vmul.f32 %v131_v30, %v48_v19 }
  0x98   :  { %107 = vrot.lane.b32.xlu0 %v105_v28, %s275_s5  ;;  %121 = vrot.lane.b32.xlu1 %v119_v31, %s276_s6 }
  0x99   :  { %v145_v33 = vpop.permute.xlu0 %144 }
  0x9a   :  { %v147_v34 = vmul.f32 %v145_v33, %v48_v19 }
  0x9c   :  { %135 = vrot.lane.b32.xlu0 %v133_v32, %s277_s7  ;;  %149 = vrot.lane.b32.xlu1 %v147_v34, %s278_s8 }
  0xa0   :  { %32 = vrot.lane.b32.xlu1 %v27_v35, %s272_s30  ;;  %155 = vrot.lane.b32.xlu0 %v49_v36, %s272_s30 }
  0xa4   :  { %36 = vrot.lane.b32.xlu1 %v27_v35, %s274_s4  ;;  %161 = vrot.lane.b32.xlu0 %v49_v36, %s274_s4 }
  0xa8   :  { %165 = vrot.lane.b32.xlu0 %v49_v36, %s273_s3 }
 0x102   :  { %v66_v37 = vpop.permute.xlu1 %65 }
 0x103   :  { %v68_v38 = vadd.f32 %v66_v37, %v54_v20 }
 0x106   :  { %v94_v39 = vpop.permute.xlu1 %93  ;;  %v80_v40 = vpop.permute.xlu0 %79 }
 0x107   :  { %v82_v41 = vadd.f32 %v80_v40, %v68_v38 }
 0x109   :  { %v96_v43 = vadd.f32 %v94_v39, %v82_v41 }
 0x10a   :  { %v122_v44 = vpop.permute.xlu1 %121  ;;  %v108_v45 = vpop.permute.xlu0 %107 }
 0x10b   :  { %v110_v46 = vadd.f32 %v108_v45, %v96_v43 }
 0x10d   :  { %v124_v48 = vadd.f32 %v122_v44, %v110_v46 }
 0x10e   :  { %v150_v49 = vpop.permute.xlu1 %149  ;;  %v136_v50 = vpop.permute.xlu0 %135 }
 0x10f   :  { %v138_v51 = vadd.f32 %v136_v50, %v124_v48 }
 0x111   :  { %v152_v53 = vadd.f32 %v150_v49, %v138_v51 }
 0x112   :  { %v33_v54 = vpop.permute.xlu1 %32  ;;  %v156_v55 = vpop.permute.xlu0 %155 }
 0x113   :  { %v35_v56 = vmul.f32 %v33_v54, %v30_v52  ;;  %v153_v57 = vadd.f32 %v152_v53, %v49_v36 }
 0x115   :  { %v158_v58 = vsub.f32 %v153_v57, %v156_v55 }
 0x116   :  { %v37_v59 = vpop.permute.xlu1 %36  ;;  %v162_v60 = vpop.permute.xlu0 %161 }
 0x117   :  { %v159_v61 = vmul.f32 %v158_v58, %v158_v58  ;;  %v39_v62 = vadd.f32 %v37_v59, %v35_v56 }
 0x119   :  { %v160_v63 = vsub.f32 0.0, %v159_v61  ;;  %v41_v0 = vsel %vm40_vm0, %v39_v62, 0.0 }
 0x11a   :  { %v42_v1 = vrot.slane %v41_v0, 4  ;;  %v166_v2 = vpop.permute.xlu0 %165 }
 0x11b   :  { %v164_v3 = vmul.f32 %v162_v60, %v160_v63 }
 0x11c   :  { %v43_v4 = vadd.f32 %v42_v1, %v41_v0 }
 0x11d   :  { %v168_v5 = vadd.f32 %v166_v2, %v164_v3 }
 0x11e   :  { %v44_v6 = vrot.slane %v43_v4, 2 }
 0x11f   :  { %v170_v7 = vsel %vm169_vm1, %v168_v5, 0.0 }
 0x120   :  { %v171_v8 = vrot.slane %v170_v7, 4  ;;  %v45_v9 = vadd.f32 %v44_v6, %v43_v4 }
 0x122   :  { %v172_v10 = vadd.f32 %v171_v8, %v170_v7  ;;  %v46_v12 = vrot.slane %v45_v9, 1 }
 0x124   :  { %v173_v11 = vrot.slane %v172_v10, 2  ;;  %v47_v15 = vadd.f32 %v46_v12, %v45_v9 }
 0x126   :  { %v174_v13 = vadd.f32 %v173_v11, %v172_v10 }
 0x128   :  { %v175_v14 = vrot.slane %v174_v13, 1 }
 0x12a   :  { %v176_v16 = vadd.f32 %v175_v14, %v174_v13 }
 0x12c   :  { %v177_v17 = vadd.f32 %v176_v16, %v47_v15 }
 0x12e   :  { %v178_v18 = vsub.f32 0.0, %v177_v17 }
 0x130   :  { %180 = vst.msk [vmem:[#allocation5] sm:$0x1] %vm179_vm2, %v178_v18 }
 0x131   :  { %247 = shalt.err (!%p244_p12)
}
 0x132   :  { %s248_s15 = scalar_lea.hbm %s335_s2, 16 }
 0x133   :  { %p249_p13 = scmp.ne.s32.totalorder %s335_s2, %s248_s15  ;;  %p252_p0 = scmp.lt.u32.totalorder %s248_s15, %s335_s2 }
 0x135   :  { %p254_p1 = pnand %p252_p0, %p249_p13 }
 0x137   :  { %257 = shalt.err (!%p254_p1)
}
 0x138   :  { %190 = dma.vmem_to_hbm [thread:$0]  %s188_s10, 16, %s335_s2, [#allocation4]  }
 0x139   :  { %260 = dma.done.wait [#allocation4], 16  }
 0x13a   :  { %261 = vsyncadd [#allocation4], 4294967280 }
 0x13b   :  { %194 = vsyncpa [#allocation3], 1 }
 0x13c   :  { %195 = vsyncpa [#allocation4], 1 }

</bundles_post_ra>
